<compile_context>
chip_gen: v7x
topology: tpu7x:2x2x1
jax: 0.10.0
libtpu: 0.0.40
codegen_flags: <defaults>
</compile_context>

<pallas_src>
import jax
import jax.numpy as jnp
from jax.experimental import pallas as pl
from jax.experimental.pallas import tpu as pltpu


def _round_up(x: int, m: int) -> int:
    return ((x + m - 1) // m) * m


def _diag_gaussian_mean_kernel(x_ref, wt_ref, b_ref, mean_ref):
    # (TB, K) @ (K, N) on the MXU with f32 accumulation, + (1, N) bias broadcast.
    mean = jnp.dot(x_ref[...], wt_ref[...], preferred_element_type=jnp.float32)
    mean_ref[...] = (mean + b_ref[...]).astype(mean_ref.dtype)


def diag_gaussian_forward(x, weight_t, bias, logstd, *,
                          max_row_tile: int = 512,
                          allow_xla_fallback: bool = True):
    """DiagGaussian forward.

    x:        (B, K) f32
    weight_t: (K, N) f32   (fc_mean.weight pre-transposed)
    bias:     (1, N) f32   (fc_mean.bias)
    logstd:   (1, N) f32   (AddBias parameter of the logstd head)

    Returns (mean, std): the parameters of FixedNormal(mean, std).
    """
    B, K = x.shape
    N = weight_t.shape[1]

    if allow_xla_fallback and B * K <= 16 * 1024:
        # Tiny problem: a fused XLA dot beats per-grid-step kernel overhead.
        mean = (x @ weight_t + bias).astype(jnp.float32)
    else:
        # Adaptive row tile: ~max_row_tile rows per step (already at the HBM
        # roofline), >= 2 steps when B >= 16 so v7x's two TensorCores both get
        # work, and a single full-extent block when only one tile is needed.
        n_tiles = pl.cdiv(B, max_row_tile)
        if B >= 16:
            n_tiles = max(n_tiles, 2)
        TB = B if n_tiles == 1 else _round_up(pl.cdiv(B, n_tiles), 8)
        grid = (pl.cdiv(B, TB),)

        # VMEM budget: double-buffered x and output tiles + (double-buffered)
        # resident weight/bias.  Only raise the scoped limit when the default
        # (16 MiB on v5e, 32 MiB on v6e/v7x) would not fit.
        vmem_bytes = 4 * (2 * TB * K + 2 * TB * N + 2 * (K * N + N))
        vmem_limit = None
        if vmem_bytes > 14 * 1024 * 1024:
            vmem_limit = min(int(vmem_bytes * 1.25) + (1 << 20), 48 * 1024 * 1024)

        cost = pl.CostEstimate(
            flops=2 * B * K * N,
            transcendentals=0,
            bytes_accessed=4 * (B * K + K * N + N + B * N),
        )

        mean = pl.pallas_call(
            _diag_gaussian_mean_kernel,
            out_shape=jax.ShapeDtypeStruct((B, N), jnp.float32),
            grid_spec=pltpu.PrefetchScalarGridSpec(
                num_scalar_prefetch=0,
                grid=grid,
                in_specs=[
                    # x: one row tile per grid step (ragged last tile handled
                    # by Pallas boundary blocks; no padded copy of x in HBM).
                    pl.BlockSpec((TB, K), lambda i: (i, 0)),
                    # weight / bias: VMEM-resident across the batch grid
                    # (constant block index).  NOTE: default pipelining keeps a
                    # second (unused) buffer for these; negligible for small K.
                    pl.BlockSpec((K, N), lambda i: (0, 0)),
                    pl.BlockSpec((1, N), lambda i: (0, 0)),
                ],
                # Unpadded (TB, N) output block: last dim equals the full array
                # dim, so no 128-lane padding and no inflated HBM writeback.
                out_specs=pl.BlockSpec((TB, N), lambda i: (i, 0)),
            ),
            compiler_params=pltpu.CompilerParams(
                dimension_semantics=("parallel",),
                vmem_limit_bytes=vmem_limit,
            ),
            cost_estimate=cost,
        )(x, weight_t, bias)

    # std is data independent of x: exp once, broadcast lazily.
    std = jnp.broadcast_to(jnp.exp(logstd), (B, N))
    return mean, std


def _orthogonal_init(key, rows, cols, gain):
    """Deterministic orthogonal init (matches torch.nn.init.orthogonal_ semantics)."""
    n = max(rows, cols)
    a = jax.random.normal(key, (n, n), dtype=jnp.float32)
    q, r = jnp.linalg.qr(a)
    d = jnp.diag(r)
    q = q * jnp.where(d >= 0.0, 1.0, -1.0)  # avoid sign(0) == 0 zeroing a column
    return gain * q[:rows, :cols]


if __name__ == "__main__":
    num_inputs, num_outputs = 32, 8
    gain = 0.01

    key = jax.random.PRNGKey(0)
    k_w, k_x1, k_x2 = jax.random.split(key, 3)

    # Parameters (deterministic, synthetic):
    #   fc_mean.weight: (num_outputs, num_inputs), orthogonal init, gain=0.01
    #   fc_mean.bias:   zeros ; logstd AddBias param: zeros
    W = _orthogonal_init(k_w, num_outputs, num_inputs, gain)     # (N, K)
    weight_t = jnp.asarray(W.T, dtype=jnp.float32)               # (K, N)
    bias = jnp.zeros((1, num_outputs), dtype=jnp.float32)
    logstd = jnp.zeros((1, num_outputs), dtype=jnp.float32)

    def check(x):
        # allow_xla_fallback=False so the Pallas kernel is exercised at demo
        # shapes; max_row_tile=16 exercises the multi-tile / ragged-tile path.
        mean, std = diag_gaussian_forward(x, weight_t, bias, logstd,
                                          allow_xla_fallback=False,
                                          max_row_tile=16)
        jax.block_until_ready((mean, std))
        ref_mean = x @ weight_t + bias
        ref_std = jnp.broadcast_to(jnp.exp(logstd), ref_mean.shape)
        assert mean.shape == ref_mean.shape and std.shape == ref_std.shape
        assert jnp.allclose(mean, ref_mean, atol=1e-5, rtol=1e-5)
        assert jnp.allclose(std, ref_std, atol=1e-6, rtol=1e-6)

    # Small aligned batch: single full-extent row block (TB == B).
    check(jax.random.normal(k_x1, (8, num_inputs), dtype=jnp.float32))
    # Ragged batch: 2 row tiles, last one partial -- validates the no-copy path.
    check(jax.random.normal(k_x2, (20, num_inputs), dtype=jnp.float32))

    # TODO(synk): FixedNormal methods (log_probs / entropy / mode) are trivial
    # elementwise follow-ups on (mean, std) and are left to plain JAX.

    print("KERNEL_OK")
</pallas_src>

<mosaic_0001>
module attributes {stable_mosaic.version = 11 : i64} {
  func.func @_diag_gaussian_mean_kernel(%arg0: i32, %arg1: memref<8x32xf32, #tpu.memory_space<vmem>>, %arg2: memref<32x8xf32, #tpu.memory_space<vmem>>, %arg3: memref<1x8xf32, #tpu.memory_space<vmem>>, %arg4: memref<8x8xf32, #tpu.memory_space<vmem>>) attributes {dimension_semantics = [#tpu.dimension_semantics<parallel>], iteration_bounds = array<i64: 1>, scalar_prefetch = 0 : i64, scratch_operands = 0 : i64, tpu.core_type = #tpu.core_type<tc>, window_params = [{transform_indices = @transform_0, window_bounds = array<i64: 8, 32>}, {pipeline_mode = #tpu.pipeline_mode<synchronous>, transform_indices = @transform_1, window_bounds = array<i64: 32, 8>}, {pipeline_mode = #tpu.pipeline_mode<synchronous>, transform_indices = @transform_2, window_bounds = array<i64: 1, 8>}, {transform_indices = @transform_3, window_bounds = array<i64: 8, 8>}]} {
    %c0 = arith.constant 0 : index
    %c0_0 = arith.constant 0 : index
    %0 = vector.load %arg1[%c0, %c0_0] : memref<8x32xf32, #tpu.memory_space<vmem>>, vector<8x32xf32>
    %c0_1 = arith.constant 0 : index
    %c0_2 = arith.constant 0 : index
    %1 = vector.load %arg2[%c0_1, %c0_2] : memref<32x8xf32, #tpu.memory_space<vmem>>, vector<32x8xf32>
    %cst = arith.constant dense<0.000000e+00> : vector<8x8xf32>
    %2 = tpu.matmul %0, %1, %cst {dimension_numbers = #tpu.dot_dimension_numbers<[1], [0], [0], [1], [0, 0, 1, 1], [], []>} : vector<8x32xf32>, vector<32x8xf32>, vector<8x8xf32> -> vector<8x8xf32>
    %c0_3 = arith.constant 0 : index
    %c0_4 = arith.constant 0 : index
    %3 = vector.load %arg3[%c0_3, %c0_4] : memref<1x8xf32, #tpu.memory_space<vmem>>, vector<1x8xf32>
    %4 = vector.broadcast %3 : vector<1x8xf32> to vector<8x8xf32>
    %5 = arith.addf %2, %4 : vector<8x8xf32>
    %c0_5 = arith.constant 0 : index
    %c0_6 = arith.constant 0 : index
    %6 = vector.load %arg4[%c0_5, %c0_6] : memref<8x8xf32, #tpu.memory_space<vmem>>, vector<8x8xf32>
    tpu.vector_store %arg4[%c0_5, %c0_6], %5 {strides = array<i32>} : memref<8x8xf32, #tpu.memory_space<vmem>>, vector<8x8xf32>,
    return
  }
  func.func @transform_0(%arg0: i32) -> (i32, i32) {
    %c0_i32 = arith.constant 0 : i32
    %c0_i32_0 = arith.constant 0 : i32
    return %arg0, %c0_i32 : i32, i32
  }
  func.func @transform_1(%arg0: i32) -> (i32, i32) {
    %c0_i32 = arith.constant 0 : i32
    %c0_i32_0 = arith.constant 0 : i32
    %c0_i32_1 = arith.constant 0 : i32
    return %c0_i32, %c0_i32_0 : i32, i32
  }
  func.func @transform_2(%arg0: i32) -> (i32, i32) {
    %c0_i32 = arith.constant 0 : i32
    %c0_i32_0 = arith.constant 0 : i32
    %c0_i32_1 = arith.constant 0 : i32
    return %c0_i32, %c0_i32_0 : i32, i32
  }
  func.func @transform_3(%arg0: i32) -> (i32, i32) {
    %c0_i32 = arith.constant 0 : i32
    %c0_i32_0 = arith.constant 0 : i32
    return %arg0, %c0_i32 : i32, i32
  }
}

</mosaic_0001>

<bundles_post_ra>
// kernel: tpu_custom_call.1
= control target key start
LH: loop header
LB: loop body
LE: loop exit
PB: predicated region body
PF: predicated region fallthrough
CT: control target
= control target key end

     0   :  { %v169_v3 = vmov 0.0|0.0   ;;  %vm170_vm0 = vmmov 0   ;;  %v171_v6 = vmov 0.0   ;;  %s223_s0 = inlined_call_operand.vmem [shape: f32[8,32], index: 0, kind: input, shape index: {}]   ;;  %s224_s1 = inlined_call_operand.vmem [shape: f32[32,8], index: 1, kind: input, shape index: {}]   ;;  %s225_s2 = inlined_call_operand.vmem [shape: f32[1,8], index: 2, kind: input, shape index: {}]   ;;  %s226_s3 = inlined_call_operand.hbm [shape: f32[8,8], index: 3, kind: output, shape index: {}]  }
   0x1   :  { %v16_v0 = vld [vmem:[%s224_s1] sm:$0xff]  ;;  %v17_v1 = vld [vmem:[%s224_s1 + $0x8] sm:$0xff]  ;;  %v18_v2 = vld [vmem:[%s224_s1 + $0x10] sm:$0xff]  ;;  %135 = vmatprep.subr.bf16.mxu0 %v169_v3  ;;  %132 = vmatprep.mubr.msk.f32.mxu0 %vm170_vm0, %v171_v6 }
   0x2   :  { %v136_v4 = vpack.c.bf16 %v17_v1, %v16_v0  ;;  %v19_v5 = vld [vmem:[%s224_s1 + $0x18] sm:$0xff] }
   0x3   :  { %8 = vsyncpa [#allocation3], 0  ;;  %v139_v7 = vpack.c.bf16 %v19_v5, %v18_v2  ;;  %v15_v8 = vld [vmem:[%s223_s0] sm:$0xff]  ;;  %vm27_vm1 = vcmask 261120   ;;  %s172_s24 = smov [#allocation2]   ;;  %vm101_vm2 = vcmask 64512  }
   0x4   :  { %137 = vmatpush3.bf16.msra.mxu0 %v136_v4  ;;  %v117_v9 = vld [vmem:[%s225_s2] ss:$0 sm:$0xff]  ;;  %s109_s1 = sshll.u32 %s172_s24, 4  ;;  %s110_s1 = int_to_ptr.vmem [resolvable:$true] %s109_s1 }
   0x5   :  { %138 = vmatprep.subr.bf16.mxu0 %v169_v3  ;;  %s145_s25 = scalar_lea.vmem %s110_s1, 128  ;;  %p150_p1 = scmp.lt.s32.totalorder %s110_s1, %s110_s1 }
   0x6   :  { %p146_p0 = scmp.ne.s32.totalorder %s110_s1, %s145_s25  ;;  %p151_p2 = scmp.lt.s32.totalorder %s145_s25, %s145_s25 }
   0x8   :  { %140 = vmatpush3.bf16.msra.mxu0 %v139_v7  ;;  %p152_p3 = por %p151_p2, %p150_p1 }
   0xa   :  { %p153_p4 = pnand %p152_p3, %p146_p0 }
   0xb   :  { %133 = vmatmul.mubr.msk.f32.vlgmr.msra.gmra.mrb[0].mxu0 %vm27_vm1, %v15_v8 }
  0xde   :  { %v97_v10 = vpop.f32.mrb[0].mxu0 }
  0xdf   :  { %v98_v11 = vadd.f32 %v117_v9, %v97_v10  ;;  %v134_v12 = vpop.f32.mrb[1].mxu0 }
  0xe1   :  { %102 = vst.msk [vmem:[#allocation2] sm:$0xff] %vm101_vm2, %v98_v11 }
  0xe2   :  { %156 = shalt.err (!%p153_p4)
}
  0xe3   :  { %s157_s27 = scalar_lea.hbm %s226_s3, 128 }
  0xe4   :  { %p158_p5 = scmp.ne.s32.totalorder %s226_s3, %s157_s27  ;;  %p161_p6 = scmp.lt.u32.totalorder %s157_s27, %s226_s3 }
  0xe6   :  { %p163_p7 = pnand %p161_p6, %p158_p5 }
  0xe8   :  { %166 = shalt.err (!%p163_p7)
}
  0xe9   :  { %112 = dma.vmem_to_hbm [thread:$0]  %s110_s1, 128, %s226_s3, [#allocation3]  }
  0xea   :  { %167 = dma.done.wait [#allocation3], 128  }
  0xeb   :  { %168 = vsyncadd [#allocation3], 4294967168 }
  0xec   :  { %116 = vsyncpa [#allocation3], 1 }

</bundles_post_ra>
